<compile_context>
chip_gen: v7x
topology: tpu7x:2x2x1
jax: 0.10.0
libtpu: 0.0.40
codegen_flags: <defaults>
</compile_context>

<pallas_src>
import functools

import jax
import jax.numpy as jnp
from jax import lax
from jax.experimental import pallas as pl
from jax.experimental.pallas import tpu as pltpu


# ---------------------------------------------------------------------------
# Pallas kernel: per-mode complex channel mixing.
# ---------------------------------------------------------------------------
def _spectral_mul_kernel(xr_ref, xi_ref, wr_ref, wi_ref, o_ref):
    # xr/xi: (TM, B, C)   wr/wi: (TM, C, O)   o: (TM, B, 2O) float32
    xr = xr_ref[...]
    xi = xi_ref[...]
    wr = wr_ref[...]
    wi = wi_ref[...]
    dn = (((2,), (1,)), ((0,), (0,)))  # contract channel, batch over modes
    # (xr + i*xi) @ (wr + i*wi) = (xr@wr - xi@wi) + i*(xr@wi + xi@wr)
    real = (lax.dot_general(xr, wr, dn, preferred_element_type=jnp.float32)
            - lax.dot_general(xi, wi, dn, preferred_element_type=jnp.float32))
    imag = (lax.dot_general(xr, wi, dn, preferred_element_type=jnp.float32)
            + lax.dot_general(xi, wr, dn, preferred_element_type=jnp.float32))
    o_ref[...] = jnp.concatenate([real, imag], axis=-1).astype(o_ref.dtype)


# ---------------------------------------------------------------------------
# Tiling / VMEM budgeting helpers.
# ---------------------------------------------------------------------------
def _round_up(v, m):
    return ((v + m - 1) // m) * m


def _vmem_budget_bytes():
    """(tile budget, vmem_limit_bytes) derived from the actual chip's VMEM."""
    cap = 64 * 1024 * 1024  # conservative fallback = v7x per-TC VMEM
    try:
        cap = int(pltpu.get_tpu_info().vmem_capacity_bytes)
    except Exception:
        pass
    budget = (5 * cap) // 8              # ~40 MiB v7x, ~80 MiB v5e/v6e
    limit = min((3 * cap) // 4, 100 * 1024 * 1024)
    return budget, limit


def _choose_mode_tile(M, B, C, O, in_itemsize, budget_bytes):
    """Largest divisor TM of M whose (padded, double-buffered) tiles fit."""
    sub_in = 8 if in_itemsize >= 4 else (16 if in_itemsize == 2 else 32)
    # Per-mode VMEM footprint with (sublane, lane) padding on trailing dims.
    x_tile = _round_up(B, sub_in) * _round_up(C, 128) * in_itemsize
    w_tile = _round_up(C, sub_in) * _round_up(O, 128) * in_itemsize
    o_tile = _round_up(B, 8) * _round_up(2 * O, 128) * 4
    per_mode = 2 * (2 * x_tile + 2 * w_tile + o_tile)   # double-buffered
    tm = max(1, min(M, budget_bytes // max(per_mode, 1)))
    # Keep >= 4 grid steps when possible: lets the "parallel" mode axis shard
    # across v7x's two TensorCores AND keep DMA/compute overlap per core.
    tm = min(tm, max(1, M // 4))
    while M % tm != 0:
        tm -= 1
    return tm


# ---------------------------------------------------------------------------
# pallas_call wrapper.
# ---------------------------------------------------------------------------
def spectral_mul_pallas(xr, xi, wr, wi):
    """xr, xi: (M, B, C); wr, wi: (M, C, O)  ->  (M, B, 2O) float32."""
    M, B, C = xr.shape
    O = wr.shape[2]
    budget, vmem_limit = _vmem_budget_bytes()
    tm = _choose_mode_tile(M, B, C, O, xr.dtype.itemsize, budget)

    flops = 4 * 2 * M * B * C * O
    bytes_accessed = (2 * M * B * C * xr.dtype.itemsize
                      + 2 * M * C * O * wr.dtype.itemsize
                      + M * B * 2 * O * 4)

    return pl.pallas_call(
        _spectral_mul_kernel,
        out_shape=jax.ShapeDtypeStruct((M, B, 2 * O), jnp.float32),
        grid=(M // tm,),
        in_specs=[pl.BlockSpec((tm, B, C), lambda m: (m, 0, 0)),
                  pl.BlockSpec((tm, B, C), lambda m: (m, 0, 0)),
                  pl.BlockSpec((tm, C, O), lambda m: (m, 0, 0)),
                  pl.BlockSpec((tm, C, O), lambda m: (m, 0, 0))],
        out_specs=pl.BlockSpec((tm, B, 2 * O), lambda m: (m, 0, 0)),
        compiler_params=pltpu.CompilerParams(
            dimension_semantics=("parallel",),
            vmem_limit_bytes=vmem_limit),
        cost_estimate=pl.CostEstimate(
            flops=flops, transcendentals=0, bytes_accessed=bytes_accessed),
    )(xr, xi, wr, wi)


# ---------------------------------------------------------------------------
# Parameter preparation (done ONCE at init time, not per forward call).
# ---------------------------------------------------------------------------
def prepare_spectral_weights(w_real, w_imag):
    """(C, O, m1, m2) real/imag weights -> (M, C, O) layout used by the kernel."""
    C, O, m1, m2 = w_real.shape
    wr = jnp.transpose(w_real, (2, 3, 0, 1)).reshape(m1 * m2, C, O)
    wi = jnp.transpose(w_imag, (2, 3, 0, 1)).reshape(m1 * m2, C, O)
    return wr, wi


# ---------------------------------------------------------------------------
# Forward pass.
# ---------------------------------------------------------------------------
@functools.partial(jax.jit, static_argnums=(3, 4, 5))
def spectral_conv2d(x, wr_mco, wi_mco, modes1, modes2,
                    compute_dtype=jnp.float32):
    """Forward pass of SpectralConv2d.

    x:       (B, C_in, H, W) float32   (NCHW)
    wr_mco:  (M, C_in, C_out) float32  (from prepare_spectral_weights)
    wi_mco:  (M, C_in, C_out) float32
    returns: (B, C_out, H, W) float32
    """
    B, C, H, W = x.shape
    M, _, O = wr_mco.shape
    Wf = W // 2 + 1

    # FFT over the last two spatial dims (same convention as torch.fft.rfft2).
    x_ft = jnp.fft.rfft2(x.astype(jnp.float32))            # (B, C, H, Wf) c64

    # Keep only the low modes; flatten modes into one axis M = modes1*modes2.
    x_low = x_ft[:, :, :modes1, :modes2]                    # (B, C, m1, m2)
    x_low = jnp.transpose(x_low, (2, 3, 0, 1)).reshape(M, B, C)
    xr = jnp.real(x_low).astype(compute_dtype)              # (M, B, C)
    xi = jnp.imag(x_low).astype(compute_dtype)              # (M, B, C)

    # Hot path in Pallas: per-mode complex channel mixing.
    y = spectral_mul_pallas(xr, xi,
                            wr_mco.astype(compute_dtype),
                            wi_mco.astype(compute_dtype))   # (M, B, 2O) f32

    out_low = (y[:, :, :O] + 1j * y[:, :, O:]).astype(jnp.complex64)
    out_low = jnp.transpose(out_low.reshape(modes1, modes2, B, O),
                            (2, 3, 0, 1))                   # (B, O, m1, m2)

    # Scatter into the zero-initialized full spectrum.
    out_ft = jnp.zeros((B, O, H, Wf), dtype=jnp.complex64)
    out_ft = out_ft.at[:, :, :modes1, :modes2].set(out_low)

    # Inverse FFT back to spatial domain (matches torch.fft.irfft2(..., s=(H,W))).
    out = jnp.fft.irfft2(out_ft, s=(H, W))                  # (B, O, H, W) f32
    return out.astype(jnp.float32)


# ---------------------------------------------------------------------------
# Pure-JAX reference mirroring the PyTorch forward exactly.
# ---------------------------------------------------------------------------
def _reference(x, w_real, w_imag, modes1, modes2):
    B, C, H, W = x.shape
    O = w_real.shape[1]
    x_ft = jnp.fft.rfft2(x.astype(jnp.float32))
    w = (w_real + 1j * w_imag).astype(jnp.complex64)
    mixed = jnp.einsum('bixy,ioxy->boxy',
                       x_ft[:, :, :modes1, :modes2], w)
    out_ft = jnp.zeros((B, O, H, W // 2 + 1), dtype=jnp.complex64)
    out_ft = out_ft.at[:, :, :modes1, :modes2].set(mixed)
    return jnp.fft.irfft2(out_ft, s=(H, W)).astype(jnp.float32)


if __name__ == "__main__":
    B, C_in, C_out = 2, 4, 4
    H, W = 16, 16
    modes1, modes2 = 4, 4

    key = jax.random.PRNGKey(0)
    kx, kwr, kwi = jax.random.split(key, 3)

    x = jax.random.normal(kx, (B, C_in, H, W), dtype=jnp.float32)

    # weights1 = scale * torch.rand(C_in, C_out, m1, m2, dtype=cfloat):
    # real and imaginary parts independently uniform in [0, 1), scaled.
    scale = 1.0 / (C_in * C_out)
    w_real = scale * jax.random.uniform(kwr, (C_in, C_out, modes1, modes2),
                                        dtype=jnp.float32)
    w_imag = scale * jax.random.uniform(kwi, (C_in, C_out, modes1, modes2),
                                        dtype=jnp.float32)

    # One-time weight layout preparation (hoisted out of the forward).
    wr_mco, wi_mco = prepare_spectral_weights(w_real, w_imag)
    wr_mco = jax.block_until_ready(wr_mco)
    wi_mco = jax.block_until_ready(wi_mco)

    out = spectral_conv2d(x, wr_mco, wi_mco, modes1, modes2)
    out = jax.block_until_ready(out)

    ref = jax.block_until_ready(_reference(x, w_real, w_imag, modes1, modes2))
    assert out.shape == (B, C_out, H, W)
    assert out.dtype == jnp.float32
    assert jnp.allclose(out, ref, atol=1e-4, rtol=1e-4)

    print("KERNEL_OK")
</pallas_src>

<mosaic_0001>
module attributes {stable_mosaic.version = 11 : i64} {
  func.func @_spectral_mul_kernel(%arg0: i32, %arg1: memref<4x2x4xf32, #tpu.memory_space<vmem>>, %arg2: memref<4x2x4xf32, #tpu.memory_space<vmem>>, %arg3: memref<4x4x4xf32, #tpu.memory_space<vmem>>, %arg4: memref<4x4x4xf32, #tpu.memory_space<vmem>>, %arg5: memref<4x2x8xf32, #tpu.memory_space<vmem>>) attributes {dimension_semantics = [#tpu.dimension_semantics<parallel>], iteration_bounds = array<i64: 4>, scalar_prefetch = 0 : i64, scratch_operands = 0 : i64, tpu.core_type = #tpu.core_type<tc>, window_params = [{transform_indices = @transform_0, window_bounds = array<i64: 4, 2, 4>}, {transform_indices = @transform_1, window_bounds = array<i64: 4, 2, 4>}, {transform_indices = @transform_2, window_bounds = array<i64: 4, 4, 4>}, {transform_indices = @transform_3, window_bounds = array<i64: 4, 4, 4>}, {transform_indices = @transform_4, window_bounds = array<i64: 4, 2, 8>}]} {
    %c0 = arith.constant 0 : index
    %c0_0 = arith.constant 0 : index
    %c0_1 = arith.constant 0 : index
    %0 = vector.load %arg1[%c0, %c0_0, %c0_1] : memref<4x2x4xf32, #tpu.memory_space<vmem>>, vector<4x2x4xf32>
    %c0_2 = arith.constant 0 : index
    %c0_3 = arith.constant 0 : index
    %c0_4 = arith.constant 0 : index
    %1 = vector.load %arg2[%c0_2, %c0_3, %c0_4] : memref<4x2x4xf32, #tpu.memory_space<vmem>>, vector<4x2x4xf32>
    %c0_5 = arith.constant 0 : index
    %c0_6 = arith.constant 0 : index
    %c0_7 = arith.constant 0 : index
    %2 = vector.load %arg3[%c0_5, %c0_6, %c0_7] : memref<4x4x4xf32, #tpu.memory_space<vmem>>, vector<4x4x4xf32>
    %c0_8 = arith.constant 0 : index
    %c0_9 = arith.constant 0 : index
    %c0_10 = arith.constant 0 : index
    %3 = vector.load %arg4[%c0_8, %c0_9, %c0_10] : memref<4x4x4xf32, #tpu.memory_space<vmem>>, vector<4x4x4xf32>
    %cst = arith.constant dense<0.000000e+00> : vector<4x2x4xf32>
    %4 = tpu.matmul %0, %2, %cst {dimension_numbers = #tpu.dot_dimension_numbers<[2], [1], [1], [2], [0, 0, 0, 1, 1, 2], [0], [0]>} : vector<4x2x4xf32>, vector<4x4x4xf32>, vector<4x2x4xf32> -> vector<4x2x4xf32>
    %cst_11 = arith.constant dense<0.000000e+00> : vector<4x2x4xf32>
    %5 = tpu.matmul %1, %3, %cst_11 {dimension_numbers = #tpu.dot_dimension_numbers<[2], [1], [1], [2], [0, 0, 0, 1, 1, 2], [0], [0]>} : vector<4x2x4xf32>, vector<4x4x4xf32>, vector<4x2x4xf32> -> vector<4x2x4xf32>
    %6 = arith.subf %4, %5 : vector<4x2x4xf32>
    %cst_12 = arith.constant dense<0.000000e+00> : vector<4x2x4xf32>
    %7 = tpu.matmul %0, %3, %cst_12 {dimension_numbers = #tpu.dot_dimension_numbers<[2], [1], [1], [2], [0, 0, 0, 1, 1, 2], [0], [0]>} : vector<4x2x4xf32>, vector<4x4x4xf32>, vector<4x2x4xf32> -> vector<4x2x4xf32>
    %cst_13 = arith.constant dense<0.000000e+00> : vector<4x2x4xf32>
    %8 = tpu.matmul %1, %2, %cst_13 {dimension_numbers = #tpu.dot_dimension_numbers<[2], [1], [1], [2], [0, 0, 0, 1, 1, 2], [0], [0]>} : vector<4x2x4xf32>, vector<4x4x4xf32>, vector<4x2x4xf32> -> vector<4x2x4xf32>
    %9 = arith.addf %7, %8 : vector<4x2x4xf32>
    %10 = tpu.concatenate %6, %9 in 2 : vector<4x2x4xf32>, vector<4x2x4xf32> -> vector<4x2x8xf32>
    %c0_14 = arith.constant 0 : index
    %c0_15 = arith.constant 0 : index
    %c0_16 = arith.constant 0 : index
    %11 = vector.load %arg5[%c0_14, %c0_15, %c0_16] : memref<4x2x8xf32, #tpu.memory_space<vmem>>, vector<4x2x8xf32>
    tpu.vector_store %arg5[%c0_14, %c0_15, %c0_16], %10 {strides = array<i32>} : memref<4x2x8xf32, #tpu.memory_space<vmem>>, vector<4x2x8xf32>,
    return
  }
  func.func @transform_0(%arg0: i32) -> (i32, i32, i32) {
    %c0_i32 = arith.constant 0 : i32
    %c0_i32_0 = arith.constant 0 : i32
    %c0_i32_1 = arith.constant 0 : i32
    return %arg0, %c0_i32, %c0_i32_0 : i32, i32, i32
  }
  func.func @transform_1(%arg0: i32) -> (i32, i32, i32) {
    %c0_i32 = arith.constant 0 : i32
    %c0_i32_0 = arith.constant 0 : i32
    %c0_i32_1 = arith.constant 0 : i32
    return %arg0, %c0_i32, %c0_i32_0 : i32, i32, i32
  }
  func.func @transform_2(%arg0: i32) -> (i32, i32, i32) {
    %c0_i32 = arith.constant 0 : i32
    %c0_i32_0 = arith.constant 0 : i32
    %c0_i32_1 = arith.constant 0 : i32
    return %arg0, %c0_i32, %c0_i32_0 : i32, i32, i32
  }
  func.func @transform_3(%arg0: i32) -> (i32, i32, i32) {
    %c0_i32 = arith.constant 0 : i32
    %c0_i32_0 = arith.constant 0 : i32
    %c0_i32_1 = arith.constant 0 : i32
    return %arg0, %c0_i32, %c0_i32_0 : i32, i32, i32
  }
  func.func @transform_4(%arg0: i32) -> (i32, i32, i32) {
    %c0_i32 = arith.constant 0 : i32
    %c0_i32_0 = arith.constant 0 : i32
    %c0_i32_1 = arith.constant 0 : i32
    return %arg0, %c0_i32, %c0_i32_0 : i32, i32, i32
  }
}

</mosaic_0001>

<bundles_post_ra>
// kernel: reverse.0
= control target key start
LH: loop header
LB: loop body
LE: loop exit
PB: predicated region body
PF: predicated region fallthrough
CT: control target
= control target key end

     0   :  { %v71_v3 = vlaneseq  ;;  %v64_v9 = vld [vmem:[#allocation0 + $0x7] ss:$-1 sm:$0xff]  ;;  %v78_v12 = vld [vmem:[#allocation0 + $0x17] ss:$-1 sm:$0xff]  ;;  %s329_s0 = inlined_call_operand.vmem [shape: f32[2,4,16,7], index: 0, kind: input, shape index: {}]   ;;  %s330_s1 = inlined_call_operand.vmem [shape: f32[2,4,16,7], index: 1, kind: output, shape index: {}]  }
   0x1   :  { %v44_v0 = vld [vmem:[%s329_s0] sm:$0xff]  ;;  %v46_v1 = vld [vmem:[%s329_s0 + $0x8] sm:$0xff]  ;;  %v48_v2 = vld [vmem:[%s329_s0 + $0x10] sm:$0xff]  ;;  %v65_v10 = vrot.slane %v64_v9, 1  ;;  %v79_v14 = vrot.slane %v78_v12, 1 }
   0x2   :  { %45 = vst [vmem:[#allocation0 + $0x8] sm:$0xff] %v44_v0  ;;  %47 = vst [vmem:[#allocation0 + $0x18] sm:$0xff] %v46_v1  ;;  %v50_v4 = vld [vmem:[%s329_s0 + $0x18] sm:$0xff]  ;;  %v52_v5 = vld [vmem:[%s329_s0 + $0x20] sm:$0xff]  ;;  %v72_v11 = vshrl.u32 %v71_v3, 7 }
   0x3   :  { %49 = vst [vmem:[#allocation0 + $0x28] sm:$0xff] %v48_v2  ;;  %v54_v6 = vld [vmem:[%s329_s0 + $0x28] sm:$0xff]  ;;  %51 = vst [vmem:[#allocation0 + $0x38] sm:$0xff] %v50_v4  ;;  %v56_v7 = vld [vmem:[%s329_s0 + $0x30] sm:$0xff] }
   0x4   :  { %53 = vst [vmem:[#allocation0 + $0x48] sm:$0xff] %v52_v5  ;;  %55 = vst [vmem:[#allocation0 + $0x58] sm:$0xff] %v54_v6  ;;  %v58_v8 = vld [vmem:[%s329_s0 + $0x38] sm:$0xff]  ;;  %v92_v13 = vld [vmem:[#allocation0 + $0x27] ss:$-1 sm:$0xff]  ;;  %vm73_vm0 = vcmp.lt.s32.totalorder %v72_v11, 7 }
   0x5   :  { %57 = vst [vmem:[#allocation0 + $0x68] sm:$0xff] %v56_v7  ;;  %59 = vst [vmem:[#allocation0 + $0x78] sm:$0xff] %v58_v8  ;;  %v93_v15 = vrot.slane %v92_v13, 1  ;;  %v106_v16 = vld [vmem:[#allocation0 + $0x37] ss:$-1 sm:$0xff] }
   0x6   :  { %66 = vst [vmem:[#allocation1] sm:$0xff] %v65_v10  ;;  %v107_v17 = vrot.slane %v106_v16, 1  ;;  %v120_v18 = vld [vmem:[#allocation0 + $0x47] ss:$-1 sm:$0xff]  ;;  %v134_v19 = vld [vmem:[#allocation0 + $0x57] ss:$-1 sm:$0xff] }
   0x7   :  { %80 = vst [vmem:[#allocation1 + $0x8] sm:$0xff] %v79_v14  ;;  %94 = vst [vmem:[#allocation1 + $0x10] sm:$0xff] %v93_v15  ;;  %v121_v20 = vrot.slane %v120_v18, 1  ;;  %v135_v21 = vrot.slane %v134_v19, 1  ;;  %v148_v22 = vld [vmem:[#allocation0 + $0x67] ss:$-1 sm:$0xff] }
   0x8   :  { %v162_v23 = vld [vmem:[#allocation0 + $0x77] ss:$-1 sm:$0xff]  ;;  %108 = vst [vmem:[#allocation1 + $0x18] sm:$0xff] %v107_v17  ;;  %v149_v24 = vrot.slane %v148_v22, 1 }
   0x9   :  { %v163_v25 = vrot.slane %v162_v23, 1  ;;  %v69_v26 = vld [vmem:[#allocation0 + $0xf] ss:$-1 sm:$0xff]  ;;  %v83_v27 = vld [vmem:[#allocation0 + $0x1f] ss:$-1 sm:$0xff]  ;;  %122 = vst [vmem:[#allocation1 + $0x20] sm:$0xff] %v121_v20 }
   0xa   :  { %v97_v28 = vld [vmem:[#allocation0 + $0x2f] ss:$-1 sm:$0xff]  ;;  %136 = vst [vmem:[#allocation1 + $0x28] sm:$0xff] %v135_v21  ;;  %v70_v29 = vrot.slane %v69_v26, 1  ;;  %v84_v30 = vrot.slane %v83_v27, 1  ;;  %150 = vst [vmem:[#allocation1 + $0x30] sm:$0xff] %v149_v24 }
   0xb   :  { %v98_v31 = vrot.slane %v97_v28, 1  ;;  %v111_v32 = vld [vmem:[#allocation0 + $0x3f] ss:$-1 sm:$0xff]  ;;  %164 = vst [vmem:[#allocation1 + $0x38] sm:$0xff] %v163_v25  ;;  %v125_v34 = vld [vmem:[#allocation0 + $0x4f] ss:$-1 sm:$0xff] }
   0xc   :  { %v112_v33 = vrot.slane %v111_v32, 1  ;;  %v139_v35 = vld [vmem:[#allocation0 + $0x5f] ss:$-1 sm:$0xff]  ;;  %74 = vst.msk [vmem:[#allocation1] sm:$0xff] %vm73_vm0, %v70_v29  ;;  %88 = vst.msk [vmem:[#allocation1 + $0x8] sm:$0xff] %vm73_vm0, %v84_v30  ;;  %v126_v36 = vrot.slane %v125_v34, 1 }
   0xd   :  { %102 = vst.msk [vmem:[#allocation1 + $0x10] sm:$0xff] %vm73_vm0, %v98_v31  ;;  %v140_v37 = vrot.slane %v139_v35, 1  ;;  %v153_v38 = vld [vmem:[#allocation0 + $0x6f] ss:$-1 sm:$0xff]  ;;  %v167_v39 = vld [vmem:[#allocation0 + $0x7f] ss:$-1 sm:$0xff] }
   0xe   :  { %116 = vst.msk [vmem:[#allocation1 + $0x18] sm:$0xff] %vm73_vm0, %v112_v33  ;;  %v154_v40 = vrot.slane %v153_v38, 1  ;;  %v168_v41 = vrot.slane %v167_v39, 1  ;;  %130 = vst.msk [vmem:[#allocation1 + $0x20] sm:$0xff] %vm73_vm0, %v126_v36 }
   0xf   :  { %144 = vst.msk [vmem:[#allocation1 + $0x28] sm:$0xff] %vm73_vm0, %v140_v37 }
  0x10   :  { %158 = vst.msk [vmem:[#allocation1 + $0x30] sm:$0xff] %vm73_vm0, %v154_v40  ;;  %172 = vst.msk [vmem:[#allocation1 + $0x38] sm:$0xff] %vm73_vm0, %v168_v41 }
  0x13   :  { %v214_v42 = vld [vmem:[#allocation1] sm:$0xff]  ;;  %v216_v43 = vld [vmem:[#allocation1 + $0x8] sm:$0xff] }
  0x14   :  { %v218_v44 = vld [vmem:[#allocation1 + $0x10] sm:$0xff]  ;;  %215 = vst [vmem:[%s330_s1] sm:$0xff] %v214_v42  ;;  %217 = vst [vmem:[%s330_s1 + $0x8] sm:$0xff] %v216_v43 }
  0x15   :  { %219 = vst [vmem:[%s330_s1 + $0x10] sm:$0xff] %v218_v44  ;;  %v220_v45 = vld [vmem:[#allocation1 + $0x18] sm:$0xff]  ;;  %v222_v46 = vld [vmem:[#allocation1 + $0x20] sm:$0xff] }
  0x16   :  { %221 = vst [vmem:[%s330_s1 + $0x18] sm:$0xff] %v220_v45  ;;  %v224_v47 = vld [vmem:[#allocation1 + $0x28] sm:$0xff]  ;;  %223 = vst [vmem:[%s330_s1 + $0x20] sm:$0xff] %v222_v46 }
  0x17   :  { %225 = vst [vmem:[%s330_s1 + $0x28] sm:$0xff] %v224_v47  ;;  %v226_v48 = vld [vmem:[#allocation1 + $0x30] sm:$0xff]  ;;  %v228_v49 = vld [vmem:[#allocation1 + $0x38] sm:$0xff] }
  0x18   :  { %227 = vst [vmem:[%s330_s1 + $0x30] sm:$0xff] %v226_v48  ;;  %229 = vst [vmem:[%s330_s1 + $0x38] sm:$0xff] %v228_v49 }

// kernel: spectral_conv2d.1
= control target key start
LH: loop header
LB: loop body
LE: loop exit
PB: predicated region body
PF: predicated region fallthrough
CT: control target
= control target key end

     0   :  { %s1790_s15 = smov 0   ;;  %s1921_s0 = inlined_call_operand.vmem [shape: f32[16,2,4], index: 0, kind: input, shape index: {}]   ;;  %s1922_s1 = inlined_call_operand.vmem [shape: f32[16,2,4], index: 1, kind: input, shape index: {}]   ;;  %s1923_s2 = inlined_call_operand.vmem [shape: f32[16,4,4], index: 2, kind: input, shape index: {}]   ;;  %s1924_s3 = inlined_call_operand.vmem [shape: f32[16,4,4], index: 3, kind: input, shape index: {}]   ;;  %s1925_s4 = inlined_call_operand.vmem [shape: f32[16,2,8], index: 4, kind: output, shape index: {}]  }
   0x1 LB: > { %s1574_s16 = sadd.s32 4294967295, %s1760_s15   ;;  %p1578_p0 = scmp.ge.s32.totalorder %s1760_s15, 1  ;;  %s1760_s15 = sphi %s1790_s15, %s14_s15  }
   0x2   : > { %p196_p1 = scmp.lt.s32.totalorder %s1760_s15, 5 }
   0x4   : > { %p197_p2 = pnand %p1578_p0, %p196_p1 }
   0x5   : > { %s1579_s17 = sshll.u32 (!%p197_p2), %s1574_s16, 2  ;;  %v1762_v0 = vmov (!%p197_p2), 0.0   ;;  %vm1763_vm0 = vmmov (!%p197_p2), 0   ;;  %vm287_vm1 = vcmask (!%p197_p2), 1043456   ;;  %vm283_vm2 = vcmask (!%p197_p2), 31744   ;;  %s1764_s6 = smov (!%p197_p2), 4  }
   0x6   : > { %200 = sbr.rel (%p197_p2) target bundleno = 379 (0x17b), region = 36  ;;  %1655 = vmatprep.subr.mxu0 (!%p197_p2), %v1762_v0  ;;  %1660 = vmatprep.subr.mxu1 (!%p197_p2), %v1762_v0  ;;  %p238_p3 = scmp.lt.s32.totalorder (!%p197_p2), %s1579_s17, 15  ;;  %vm1477_vm3 = vcmask (!%p197_p2), 58368  }
   0x7   : > { %1657 = vmatprep.mubr.msk.f32.mxu0 (!%p197_p2), %vm1763_vm0, %v1762_v0  ;;  %1662 = vmatprep.mubr.msk.f32.mxu1 (!%p197_p2), %vm1763_vm0, %v1762_v0 }
   0xd   : > { %s1927_s17 = smov (!%p238_p3, %s1579_s17), 15 }
   0xe   : > { %s1584_s18 = sshll.u32 %s1927_s17, 2  ;;  %s1804_s19 = sshll.u32 %s1927_s17, 1 }
   0xf   : > { %s253_s22 = scalar_lea.vmem %s1923_s2, %s1584_s18  ;;  %s241_s25 = scalar_lea.vmem %s1921_s0, %s1804_s19 }
  0x10   : > { %v275_v1 = vld [vmem:[%s253_s22] sm:$0xf]  ;;  %v276_v2 = vld [vmem:[%s253_s22 + $0x4] sm:$0xf]  ;;  %v277_v5 = vld [vmem:[%s253_s22 + $0x8] sm:$0xf]  ;;  %s259_s28 = scalar_lea.vmem %s1924_s3, %s1584_s18  ;;  %s247_s5 = scalar_lea.vmem %s1922_s1, %s1804_s19 }
  0x11   : > { %1656 = vmatpush3.msk.msra.mxu0 %vm287_vm1, %v275_v1  ;;  %1661 = vmatpush3.msk.msra.mxu1 %vm287_vm1, %v276_v2  ;;  %v1815_v3 = vld [vmem:[%s241_s25] sm:$0x3]  ;;  %v1817_v4 = vld [vmem:[%s241_s25 + $0x2] sm:$0x3]  ;;  %v278_v6 = vld [vmem:[%s253_s22 + $0xc] sm:$0xf]  ;;  %s265_s9 = scalar_lea.vmem %s1925_s4, %s1804_s19 }
  0x12   : > { %1658 = vmatmul.mubr.msk.f32.vlgmr.msra.gmra.mrb[0].mxu0 %vm283_vm2, %v1815_v3  ;;  %1663 = vmatmul.mubr.msk.f32.vlgmr.msra.gmra.mrb[0].mxu1 %vm283_vm2, %v1817_v4  ;;  %v1828_v7 = vld [vmem:[%s241_s25 + $0x4] sm:$0x3]  ;;  %v1830_v8 = vld [vmem:[%s241_s25 + $0x6] sm:$0x3]  ;;  %v279_v9 = vld [vmem:[%s259_s28] sm:$0xf] }
  0x13   : > { %1665 = vmatprep.subr.mxu0 %v1762_v0  ;;  %1670 = vmatprep.subr.mxu1 %v1762_v0  ;;  %v280_v10 = vld [vmem:[%s259_s28 + $0x4] sm:$0xf]  ;;  %v271_v11 = vld [vmem:[%s247_s5] sm:$0x3]  ;;  %v272_v12 = vld [vmem:[%s247_s5 + $0x2] sm:$0x3] }
  0x14   : > { %1666 = vmatpush3.msk.msra.mxu0 %vm287_vm1, %v277_v5  ;;  %1667 = vmatprep.mubr.msk.f32.mxu0 %vm1763_vm0, %v1762_v0  ;;  %v281_v13 = vld [vmem:[%s259_s28 + $0x8] sm:$0xf]  ;;  %v282_v14 = vld [vmem:[%s259_s28 + $0xc] sm:$0xf]  ;;  %v273_v15 = vld [vmem:[%s247_s5 + $0x4] sm:$0x3] }
  0x15   : > { %1671 = vmatpush3.msk.msra.mxu1 %vm287_vm1, %v278_v6  ;;  %1672 = vmatprep.mubr.msk.f32.mxu1 %vm1763_vm0, %v1762_v0  ;;  %v274_v16 = vld [vmem:[%s247_s5 + $0x6] sm:$0x3] }
  0x16   : > { %1668 = vmatmul.mubr.msk.f32.vlgmr.msra.gmra.mrb[2].mxu0 %vm283_vm2, %v1828_v7  ;;  %1673 = vmatmul.mubr.msk.f32.vlgmr.msra.gmra.mrb[2].mxu1 %vm283_vm2, %v1830_v8 }
  0x17   : > { %1675 = vmatprep.subr.mxu0 %v1762_v0  ;;  %1680 = vmatprep.subr.mxu1 %v1762_v0 }
  0x18   : > { %1676 = vmatpush3.msk.msra.mxu0 %vm287_vm1, %v279_v9  ;;  %1677 = vmatprep.mubr.msk.f32.mxu0 %vm1763_vm0, %v1762_v0 }
  0x19   : > { %1681 = vmatpush3.msk.msra.mxu1 %vm287_vm1, %v280_v10  ;;  %1682 = vmatprep.mubr.msk.f32.mxu1 %vm1763_vm0, %v1762_v0 }
  0x1a   : > { %1678 = vmatmul.mubr.msk.f32.vlgmr.msra.gmra.mrb[4].mxu0 %vm283_vm2, %v271_v11  ;;  %1683 = vmatmul.mubr.msk.f32.vlgmr.msra.gmra.mrb[4].mxu1 %vm283_vm2, %v272_v12 }
  0x1b   : > { %1685 = vmatprep.subr.mxu0 %v1762_v0  ;;  %1690 = vmatprep.subr.mxu1 %v1762_v0 }
  0x1c   : > { %1686 = vmatpush3.msk.msra.mxu0 %vm287_vm1, %v281_v13  ;;  %1687 = vmatprep.mubr.msk.f32.mxu0 %vm1763_vm0, %v1762_v0 }
  0x1d   : > { %1691 = vmatpush3.msk.msra.mxu1 %vm287_vm1, %v282_v14  ;;  %1692 = vmatprep.mubr.msk.f32.mxu1 %vm1763_vm0, %v1762_v0 }
  0x1e   : > { %1688 = vmatmul.mubr.msk.f32.vlgmr.msra.gmra.mrb[6].mxu0 %vm283_vm2, %v273_v15  ;;  %1693 = vmatmul.mubr.msk.f32.vlgmr.msra.gmra.mrb[6].mxu1 %vm283_vm2, %v274_v16 }
  0x1f   : > { %1695 = vmatprep.subr.mxu0 %v1762_v0  ;;  %1700 = vmatprep.subr.mxu1 %v1762_v0 }
  0x20   : > { %1696 = vmatpush3.msk.msra.mxu0 %vm287_vm1, %v275_v1  ;;  %1697 = vmatprep.mubr.msk.f32.mxu0 %vm1763_vm0, %v1762_v0 }
  0x21   : > { %1701 = vmatpush3.msk.msra.mxu1 %vm287_vm1, %v276_v2  ;;  %1702 = vmatprep.mubr.msk.f32.mxu1 %vm1763_vm0, %v1762_v0 }
  0x22   : > { %1698 = vmatmul.mubr.msk.f32.vlgmr.msra.gmra.mrb[8].mxu0 %vm283_vm2, %v271_v11  ;;  %1703 = vmatmul.mubr.msk.f32.vlgmr.msra.gmra.mrb[8].mxu1 %vm283_vm2, %v272_v12 }
  0x23   : > { %1705 = vmatprep.subr.mxu0 %v1762_v0  ;;  %1710 = vmatprep.subr.mxu1 %v1762_v0 }
  0x24   : > { %1706 = vmatpush3.msk.msra.mxu0 %vm287_vm1, %v277_v5  ;;  %1707 = vmatprep.mubr.msk.f32.mxu0 %vm1763_vm0, %v1762_v0 }
  0x25   : > { %1711 = vmatpush3.msk.msra.mxu1 %vm287_vm1, %v278_v6  ;;  %1712 = vmatprep.mubr.msk.f32.mxu1 %vm1763_vm0, %v1762_v0 }
  0x26   : > { %1708 = vmatmul.mubr.msk.f32.vlgmr.msra.gmra.mrb[10].mxu0 %vm283_vm2, %v273_v15  ;;  %1713 = vmatmul.mubr.msk.f32.vlgmr.msra.gmra.mrb[10].mxu1 %vm283_vm2, %v274_v16 }
  0x27   : > { %1715 = vmatprep.subr.mxu0 %v1762_v0  ;;  %1720 = vmatprep.subr.mxu1 %v1762_v0 }
  0x28   : > { %1716 = vmatpush3.msk.msra.mxu0 %vm287_vm1, %v279_v9  ;;  %1717 = vmatprep.mubr.msk.f32.mxu0 %vm1763_vm0, %v1762_v0 }
  0x29   : > { %1721 = vmatpush3.msk.msra.mxu1 %vm287_vm1, %v280_v10  ;;  %1722 = vmatprep.mubr.msk.f32.mxu1 %vm1763_vm0, %v1762_v0 }
  0x2a   : > { %1718 = vmatmul.mubr.msk.f32.vlgmr.msra.gmra.mrb[8].mxu0 %vm283_vm2, %v1815_v3  ;;  %1723 = vmatmul.mubr.msk.f32.vlgmr.msra.gmra.mrb[8].mxu1 %vm283_vm2, %v1817_v4 }
  0x2b   : > { %1725 = vmatprep.subr.mxu0 %v1762_v0  ;;  %1730 = vmatprep.subr.mxu1 %v1762_v0 }
  0x2c   : > { %1726 = vmatpush3.msk.msra.mxu0 %vm287_vm1, %v281_v13  ;;  %1727 = vmatprep.mubr.msk.f32.mxu0 %vm1763_vm0, %v1762_v0 }
  0x2d   : > { %1731 = vmatpush3.msk.msra.mxu1 %vm287_vm1, %v282_v14  ;;  %1732 = vmatprep.mubr.msk.f32.mxu1 %vm1763_vm0, %v1762_v0 }
  0x2e   : > { %1728 = vmatmul.mubr.msk.f32.vlgmr.msra.gmra.mrb[10].mxu0 %vm283_vm2, %v1828_v7  ;;  %1733 = vmatmul.mubr.msk.f32.vlgmr.msra.gmra.mrb[10].mxu1 %vm283_vm2, %v1830_v8 }
  0xe5   : > { %v357_v17 = vpop.f32.mrb[0].mxu0  ;;  %v433_v18 = vpop.f32.mrb[0].mxu1 }
  0xe6   : > { %v1659_v19 = vpop.f32.mrb[1].mxu0  ;;  %v1664_v20 = vpop.f32.mrb[1].mxu1 }
  0xe9   : > { %v509_v21 = vpop.f32.mrb[2].mxu0  ;;  %v585_v22 = vpop.f32.mrb[2].mxu1 }
  0xea   : > { %v1669_v23 = vpop.f32.mrb[3].mxu0  ;;  %v1674_v24 = vpop.f32.mrb[3].mxu1 }
  0xed   : > { %v661_v25 = vpop.f32.mrb[4].mxu0  ;;  %v737_v26 = vpop.f32.mrb[4].mxu1 }
  0xee   : > { %v893_v27 = vsub.f32 %v357_v17, %v661_v25  ;;  %v894_v28 = vsub.f32 %v433_v18, %v737_v26  ;;  %v1679_v29 = vpop.f32.mrb[5].mxu0  ;;  %v1684_v30 = vpop.f32.mrb[5].mxu1 }
  0xf1   : > { %v813_v31 = vpop.f32.mrb[6].mxu0  ;;  %v889_v32 = vpop.f32.mrb[6].mxu1 }
  0xf2   : > { %v895_v33 = vsub.f32 %v509_v21, %v813_v31  ;;  %v896_v34 = vsub.f32 %v585_v22, %v889_v32  ;;  %v1689_v35 = vpop.f32.mrb[7].mxu0  ;;  %v1694_v36 = vpop.f32.mrb[7].mxu1 }
  0xfd   : > { %v1243_v37 = vpop.f32.mrb[8].mxu0  ;;  %v1313_v38 = vpop.f32.mrb[8].mxu1 }
  0xfe   : > { %v1724_v39 = vpop.f32.mrb[9].mxu1  ;;  %1461 = vrot.lane.b32.xlu0 %v1243_v37, %s1764_s6  ;;  %v1719_v40 = vpop.f32.mrb[9].mxu0 }
 0x101   : > { %v1383_v41 = vpop.f32.mrb[10].mxu0  ;;  %v1453_v42 = vpop.f32.mrb[10].mxu1 }
 0x102   : > { %v1734_v43 = vpop.f32.mrb[11].mxu1  ;;  %1463 = vrot.lane.b32.xlu0 %v1313_v38, %s1764_s6  ;;  %1465 = vrot.lane.b32.xlu1 %v1383_v41, %s1764_s6  ;;  %v1729_v44 = vpop.f32.mrb[11].mxu0 }
 0x106   : > { %1467 = vrot.lane.b32.xlu1 %v1453_v42, %s1764_s6 }
 0x170   : > { %v1462_v45 = vpop.permute.xlu0 %1461 }
 0x171   : > { %v1473_v46 = vsel %vm283_vm2, %v893_v27, %v1462_v45 }
 0x172   : > { %1478 = vst.msk [vmem:[%s265_s9] sm:$0x3] %vm1477_vm3, %v1473_v46 }
 0x174   : > { %v1464_v47 = vpop.permute.xlu0 %1463  ;;  %v1466_v48 = vpop.permute.xlu1 %1465 }
 0x175   : > { %v1474_v49 = vsel %vm283_vm2, %v894_v28, %v1464_v47  ;;  %v1475_v50 = vsel %vm283_vm2, %v895_v33, %v1466_v48 }
 0x176   : > { %1479 = vst.msk [vmem:[%s265_s9 + $0x2] sm:$0x3] %vm1477_vm3, %v1474_v49  ;;  %1480 = vst.msk [vmem:[%s265_s9 + $0x4] sm:$0x3] %vm1477_vm3, %v1475_v50 }
 0x178   : > { %v1468_v51 = vpop.permute.xlu1 %1467 }
 0x179   : > { %v1476_v52 = vsel %vm283_vm2, %v896_v34, %v1468_v51 }
 0x17a   : > { %1481 = vst.msk [vmem:[%s265_s9 + $0x6] sm:$0x3] %vm1477_vm3, %v1476_v52 }
 0x17b PF: > { %s14_s15 = sadd.s32 1, %s1760_s15  }
 0x17c   : > { %p11_p4 = scmp.ge.s32.totalorder %s14_s15, 6  }
 0x17e   :  { %13 = sbr.rel (!%p11_p4) target bundleno = 1 (0x1), region = 75 }

</bundles_post_ra>
